<compile_context>
chip_gen: v7x
topology: tpu7x:2x2x1
jax: 0.10.0
libtpu: 0.0.40
codegen_flags: <defaults>
</compile_context>

<pallas_src>
import jax
import jax.numpy as jnp
from jax.experimental import pallas as pl
from jax.experimental.pallas import tpu as pltpu


def _positive_log_plus_one_kernel(x_ref, o_ref):
    x = x_ref[...]
    # relu(log1p(clamp(x, -0.99999))) == log1p(max(x, 0))
    o_ref[...] = jnp.log1p(jnp.maximum(x, jnp.zeros_like(x))).astype(o_ref.dtype)


def _jnp_fallback(x):
    # Same math as the kernel (used for tiny inputs where launch cost dominates).
    return jnp.log1p(jnp.maximum(x, jnp.zeros_like(x))).astype(x.dtype)


def _default_block_bytes() -> int:
    # v7x (~3.2 TB/s/TC): 6 MiB blocks keep the ~0.35 us/step cost <10% and the
    # double-buffered in+out footprint (4x block = 24 MiB) under the 32 MiB
    # scoped-VMEM default.  v5e/v6e: 2 MiB blocks are already <=10% overhead and
    # fit the 16 MiB v5e scoped default without a vmem_limit override.
    try:
        kind = jax.devices()[0].device_kind.lower()
    except Exception:
        return 2 << 20
    if "v7" in kind or "7x" in kind:
        return 6 << 20
    return 2 << 20


def positive_log_plus_one(
    x: jax.Array,
    *,
    target_block_bytes: int | None = None,
    min_pallas_bytes: int = 256 * 1024,
) -> jax.Array:
    """Elementwise relu(log1p(clamp(x, -0.99999))) via a Pallas TPU kernel."""
    orig_shape = x.shape
    dtype = x.dtype
    n = x.size
    if n == 0:
        return x

    itemsize = jnp.dtype(dtype).itemsize
    total_bytes = n * itemsize

    # Tiny inputs: a single fused XLA elementwise op beats kernel launch cost.
    if total_bytes < min_pallas_bytes:
        return _jnp_fallback(x)

    if target_block_bytes is None:
        target_block_bytes = _default_block_bytes()

    cost = pl.CostEstimate(
        flops=2 * n, transcendentals=n, bytes_accessed=2 * total_bytes
    )
    cparams = pltpu.CompilerParams(dimension_semantics=("parallel",))

    x_flat = x.reshape(-1)  # contiguous -> bitcast, no HBM traffic

    if n % 128 == 0:
        # ---- 2D lane-dense path (no padding needed). ----
        sub = {1: 32, 2: 16}.get(itemsize, 8)  # min sublane tile for this dtype
        lane = 128
        for w in (4096, 2048, 1024, 512, 256, 128):
            if n % w == 0 and n // w >= sub:
                lane = w
                break
        rows = n // lane
        x2d = x_flat.reshape(rows, lane)  # free bitcast

        tr = max(sub, (target_block_bytes // (lane * itemsize)) // sub * sub)
        if rows <= tr:
            tr = rows  # single full-extent block along the row dim
        n_steps = pl.cdiv(rows, tr)

        # v7x megacore: with meaningful work, keep >= 4 steps (>= 2 per core)
        # so both TensorCores get balanced work and each pipelines its DMAs.
        if total_bytes > (2 << 20) and n_steps < 4:
            tr = max(sub, ((pl.cdiv(rows, 4) + sub - 1) // sub) * sub)
            n_steps = pl.cdiv(rows, tr)

        out2d = pl.pallas_call(
            _positive_log_plus_one_kernel,
            out_shape=jax.ShapeDtypeStruct((rows, lane), dtype),
            grid_spec=pltpu.PrefetchScalarGridSpec(
                num_scalar_prefetch=0,
                grid=(n_steps,),
                in_specs=[pl.BlockSpec((tr, lane), lambda i: (i, 0))],
                out_specs=pl.BlockSpec((tr, lane), lambda i: (i, 0)),
            ),
            compiler_params=cparams,
            cost_estimate=cost,
        )(x2d)
        return out2d.reshape(orig_shape)

    # ---- Ragged path (n % 128 != 0): 1D cdiv grid, partial last block is
    # masked on store by Pallas.  No wrapper-side pad/slice copies. ----
    max_block = max(1, target_block_bytes // itemsize)
    if n <= max_block:
        block_n = n  # single full-extent block (allowed even if not /128)
    else:
        block_n = max(1024, (max_block // 1024) * 1024)
    n_steps = pl.cdiv(n, block_n)
    if total_bytes > (2 << 20) and n_steps < 4:
        block_n = max(1024, ((pl.cdiv(n, 4) + 1023) // 1024) * 1024)
        n_steps = pl.cdiv(n, block_n)

    out_flat = pl.pallas_call(
        _positive_log_plus_one_kernel,
        out_shape=jax.ShapeDtypeStruct((n,), dtype),
        grid_spec=pltpu.PrefetchScalarGridSpec(
            num_scalar_prefetch=0,
            grid=(n_steps,),
            in_specs=[pl.BlockSpec((block_n,), lambda i: (i,))],
            out_specs=pl.BlockSpec((block_n,), lambda i: (i,)),
        ),
        compiler_params=cparams,
        cost_estimate=cost,
    )(x_flat)
    return out_flat.reshape(orig_shape)


def _reference(x):
    # Original module formula (clamp -> log1p -> relu), for verification.
    x = jnp.maximum(x, -0.99999)
    return jnp.maximum(jnp.log1p(x), 0.0)


if __name__ == "__main__":
    key = jax.random.PRNGKey(0)
    k1, k2, k3 = jax.random.split(key, 3)

    # 1) Small NCHW activation from the module context, forced through the
    #    Pallas 2D lane-dense path (n = 2048, multiple of 128).
    x1 = jax.random.normal(k1, (2, 4, 16, 16), dtype=jnp.float32) * 2.0
    y1 = jax.block_until_ready(positive_log_plus_one(x1, min_pallas_bytes=0))
    assert y1.shape == x1.shape and y1.dtype == x1.dtype
    assert jnp.allclose(y1, _reference(x1), atol=1e-6, rtol=1e-6)

    # 2) Ragged element count (n % 128 != 0): multi-block 1D path with a masked
    #    partial last block (tiny block size to exercise the cdiv grid).
    x2 = jax.random.normal(k2, (129, 33), dtype=jnp.float32) * 2.0
    y2 = jax.block_until_ready(
        positive_log_plus_one(x2, target_block_bytes=4096, min_pallas_bytes=0)
    )
    assert y2.shape == x2.shape and y2.dtype == x2.dtype
    assert jnp.allclose(y2, _reference(x2), atol=1e-6, rtol=1e-6)

    # 3) Multi-step 2D path (several grid steps along the sublane axis).
    x3 = jax.random.normal(k3, (1024, 512), dtype=jnp.float32)
    y3 = jax.block_until_ready(
        positive_log_plus_one(x3, target_block_bytes=64 * 1024, min_pallas_bytes=0)
    )
    assert jnp.allclose(y3, _reference(x3), atol=1e-6, rtol=1e-6)

    # 4) Default call (tiny input takes the fused-jnp early-out) agrees.
    y4 = jax.block_until_ready(positive_log_plus_one(x1))
    assert jnp.allclose(y4, y1, atol=1e-6, rtol=1e-6)

    print("KERNEL_OK")
</pallas_src>

<mosaic_0001>
module attributes {stable_mosaic.version = 11 : i64} {
  func.func @_positive_log_plus_one_kernel(%arg0: i32, %arg1: memref<8x256xf32, #tpu.memory_space<vmem>>, %arg2: memref<8x256xf32, #tpu.memory_space<vmem>>) attributes {dimension_semantics = [#tpu.dimension_semantics<parallel>], iteration_bounds = array<i64: 1>, scalar_prefetch = 0 : i64, scratch_operands = 0 : i64, tpu.core_type = #tpu.core_type<tc>, window_params = [{transform_indices = @transform_0, window_bounds = array<i64: 8, 256>}, {transform_indices = @transform_1, window_bounds = array<i64: 8, 256>}]} {
    %c0 = arith.constant 0 : index
    %c0_0 = arith.constant 0 : index
    %0 = vector.load %arg1[%c0, %c0_0] : memref<8x256xf32, #tpu.memory_space<vmem>>, vector<8x256xf32>
    %cst = arith.constant 0.000000e+00 : f32
    %1 = vector.broadcast %cst : f32 to vector<8x256xf32>
    %2 = arith.maximumf %0, %1 : vector<8x256xf32>
    %3 = math.log1p %2 : vector<8x256xf32>
    %c0_1 = arith.constant 0 : index
    %c0_2 = arith.constant 0 : index
    %4 = vector.load %arg2[%c0_1, %c0_2] : memref<8x256xf32, #tpu.memory_space<vmem>>, vector<8x256xf32>
    tpu.vector_store %arg2[%c0_1, %c0_2], %3 {strides = array<i32>} : memref<8x256xf32, #tpu.memory_space<vmem>>, vector<8x256xf32>,
    return
  }
  func.func @transform_0(%arg0: i32) -> (i32, i32) {
    %c0_i32 = arith.constant 0 : i32
    %c0_i32_0 = arith.constant 0 : i32
    return %arg0, %c0_i32 : i32, i32
  }
  func.func @transform_1(%arg0: i32) -> (i32, i32) {
    %c0_i32 = arith.constant 0 : i32
    %c0_i32_0 = arith.constant 0 : i32
    return %arg0, %c0_i32 : i32, i32
  }
}

</mosaic_0001>

<bundles_post_ra>
// kernel: tpu_custom_call.1
= control target key start
LH: loop header
LB: loop body
LE: loop exit
PB: predicated region body
PF: predicated region fallthrough
CT: control target
= control target key end

     0   :  { %6 = vsyncpa [#allocation3], 0  ;;  %s150_s0 = inlined_call_operand.hbm [shape: f32[8,256], index: 0, kind: input, shape index: {}]   ;;  %s151_s1 = inlined_call_operand.hbm [shape: f32[8,256], index: 1, kind: output, shape index: {}]  }
   0x1   :  { %7 = vsyncpa [#allocation4], 0  ;;  %s114_s6 = smov [#allocation2]   ;;  %s66_s10 = scalar_lea.hbm %s150_s0, 256 }
   0x2   :  { %s14_s7 = sshll.u32 %s114_s6, 4  ;;  %p67_p0 = scmp.ne.s32.totalorder %s150_s0, %s66_s10  ;;  %s15_s7 = int_to_ptr.vmem [resolvable:$true] %s14_s7 }
   0x3   :  { %p70_p1 = scmp.lt.u32.totalorder %s66_s10, %s150_s0 }
   0x5   :  { %p72_p2 = pnand %p70_p1, %p67_p0 }
   0x7   :  { %75 = shalt.err (!%p72_p2)
}
   0x8   :  { %s76_s15 = scalar_lea.vmem %s15_s7, 256  ;;  %p81_p4 = scmp.lt.s32.totalorder %s15_s7, %s15_s7 }
   0x9   :  { %p77_p3 = scmp.ne.s32.totalorder %s15_s7, %s76_s15  ;;  %p82_p5 = scmp.lt.s32.totalorder %s76_s15, %s76_s15 }
   0xb   :  { %p83_p6 = por %p82_p5, %p81_p4 }
   0xd   :  { %p84_p7 = pnand %p83_p6, %p77_p3 }
   0xf   :  { %87 = shalt.err (!%p84_p7)
}
  0x10   :  { %17 = dma.hbm_to_vmem [thread:$0]  %s150_s0, 256, %s15_s7, [#allocation3]  }
  0x11   :  { %110 = dma.done.wait [#allocation3], 256  }
  0x12   :  { %111 = vsyncadd [#allocation3], 4294967040  ;;  %v21_v0 = vld [vmem:[#allocation2] sm:$0xff]  ;;  %v22_v1 = vld [vmem:[#allocation2 + $0x8] sm:$0xff]  ;;  %s115_s0 = smov [#allocation5]  }
  0x13   :  { %v23_v2 = vmax.f32 %v21_v0, 0.0  ;;  %v24_v3 = vmax.f32 %v22_v1, 0.0  ;;  %s51_s18 = sshll.u32 %s115_s0, 4  ;;  %s52_s18 = int_to_ptr.vmem [resolvable:$true] %s51_s18 }
  0x14   :  { %s88_s19 = scalar_lea.vmem %s52_s18, 256  ;;  %p93_p9 = scmp.lt.s32.totalorder %s52_s18, %s52_s18 }
  0x15   :  { %v25_v4 = vadd.f32 1.0, %v23_v2  ;;  %v34_v5 = vadd.f32 1.0, %v24_v3  ;;  %v28_v6 = vmul.f32 -0.5, %v23_v2  ;;  %v37_v7 = vmul.f32 -0.5, %v24_v3  ;;  %p89_p8 = scmp.ne.s32.totalorder %s52_s18, %s88_s19  ;;  %p94_p10 = scmp.lt.s32.totalorder %s88_s19, %s88_s19 }
  0x16   :  { %v31_v9 = vand.u32 2147483647, %v23_v2  ;;  %v40_v11 = vand.u32 2147483647, %v24_v3 }
  0x17   :  { %62 = vlog2.f32 %v25_v4  ;;  %v29_v8 = vadd.f32 1.0, %v28_v6  ;;  %v38_v10 = vadd.f32 1.0, %v37_v7  ;;  %p95_p11 = por %p94_p10, %p93_p9 }
  0x18   :  { %64 = vlog2.f32 %v34_v5  ;;  %vm32_vm0 = vcmp.lt.f32.partialorder %v31_v9, 0.0004427343  ;;  %vm41_vm1 = vcmp.lt.f32.partialorder %v40_v11, 0.0004427343 }
  0x19   :  { %v30_v12 = vmul.f32 %v29_v8, %v23_v2  ;;  %v39_v14 = vmul.f32 %v38_v10, %v24_v3  ;;  %p96_p12 = pnand %p95_p11, %p89_p8 }
  0x21   :  { %v63_v13 = vpop.eup %62 }
  0x22   :  { %v65_v15 = vpop.eup %64  ;;  %v27_v16 = vmul.f32 0.6931472, %v63_v13 }
  0x23   :  { %v36_v17 = vmul.f32 0.6931472, %v65_v15 }
  0x24   :  { %v33_v18 = vsel %vm32_vm0, %v30_v12, %v27_v16 }
  0x25   :  { %43 = vst [vmem:[#allocation5] sm:$0xff] %v33_v18  ;;  %v42_v19 = vsel %vm41_vm1, %v39_v14, %v36_v17 }
  0x26   :  { %44 = vst [vmem:[#allocation5 + $0x8] sm:$0xff] %v42_v19 }
  0x27   :  { %99 = shalt.err (!%p96_p12)
}
  0x28   :  { %s100_s22 = scalar_lea.hbm %s151_s1, 256 }
  0x29   :  { %p101_p13 = scmp.ne.s32.totalorder %s151_s1, %s100_s22  ;;  %p104_p0 = scmp.lt.u32.totalorder %s100_s22, %s151_s1 }
  0x2b   :  { %p106_p1 = pnand %p104_p0, %p101_p13 }
  0x2d   :  { %109 = shalt.err (!%p106_p1)
}
  0x2e   :  { %54 = dma.vmem_to_hbm [thread:$0]  %s52_s18, 256, %s151_s1, [#allocation4]  }
  0x2f   :  { %112 = dma.done.wait [#allocation4], 256  }
  0x30   :  { %113 = vsyncadd [#allocation4], 4294967040 }
  0x31   :  { %58 = vsyncpa [#allocation3], 1 }
  0x32   :  { %59 = vsyncpa [#allocation4], 1 }

</bundles_post_ra>
